<compile_context>
chip_gen: v7x
topology: tpu7x:2x2x1
jax: 0.10.0
libtpu: 0.0.40
codegen_flags: <defaults>
</compile_context>

<pallas_src>
import functools
import math

import jax
import jax.numpy as jnp
from jax.experimental import pallas as pl
from jax.experimental.pallas import tpu as pltpu


# Portable VMEM budgeting (safe on v7x's 64 MiB physical VMEM and well under
# v5e/v6e's 128 MiB).
_VMEM_BUDGET_BYTES = 40 * 1024 * 1024   # allowed double-buffered working set
_VMEM_LIMIT_BYTES = 48 * 1024 * 1024    # scoped VMEM limit handed to Mosaic


def _round_up(x, m):
    return ((x + m - 1) // m) * m


# --------------------------------------------------------------------------- #
# Stage 1: h = feat @ W  (row-tiled projection; W resident via constant index)
# --------------------------------------------------------------------------- #
def _proj_kernel(feat_ref, w_ref, h_ref):
    h_ref[...] = jnp.dot(
        feat_ref[...], w_ref[...], preferred_element_type=jnp.float32
    ).astype(h_ref.dtype)


# --------------------------------------------------------------------------- #
# Stage 2: out = adj @ h
#   Output block index is constant along K, so out_ref stays resident across
#   the reduction and serves as the f32 accumulator (no scratch needed).
# --------------------------------------------------------------------------- #
def _spmm_streamed_kernel(adj_ref, h_ref, out_ref):
    """h streamed one (k_tile, out_feat) block per reduction step."""

    @pl.when(pl.program_id(1) == 0)
    def _():
        out_ref[...] = jnp.zeros_like(out_ref)

    out_ref[...] += jnp.dot(
        adj_ref[...], h_ref[...], preferred_element_type=jnp.float32
    )


def _spmm_pinned_kernel(adj_ref, h_ref, out_ref, *, k_tile):
    """h fully resident in VMEM (constant block index -> DMA'd exactly once)."""
    k = pl.program_id(1)

    @pl.when(k == 0)
    def _():
        out_ref[...] = jnp.zeros_like(out_ref)

    start = pl.multiple_of(k * k_tile, k_tile)
    out_ref[...] += jnp.dot(
        adj_ref[...],
        h_ref[pl.ds(start, k_tile), :],
        preferred_element_type=jnp.float32,
    )


@functools.partial(
    jax.jit, static_argnames=("row_tile", "k_tile", "h_dtype", "pin_h")
)
def decoder_forward(
    feat,
    weight,
    adj,
    *,
    row_tile=512,
    k_tile=1024,
    h_dtype=None,
    pin_h=None,
):
    """Pallas implementation of Decoder.forward(feat, adj).

    adj is streamed in its stored dtype (no wrapper cast — casting in the
    wrapper only adds HBM traffic).  h_dtype controls the dtype the latent
    projection is written/streamed in (None -> feat.dtype; bf16 halves h
    bytes, accumulation stays f32).  pin_h=None auto-decides whether h is
    pinned fully resident in VMEM based on the VMEM budget.
    """
    n, in_feat = feat.shape
    in_feat_w, out_feat = weight.shape
    assert in_feat == in_feat_w
    assert adj.shape == (n, n)

    if h_dtype is None:
        h_dtype = feat.dtype
    h_dtype = jnp.dtype(h_dtype)
    out_dtype = jnp.float32  # matches torch FloatTensor output; enables
                             # accumulating directly into the output block.

    adj_itemsize = jnp.dtype(adj.dtype).itemsize
    h_itemsize = h_dtype.itemsize

    # ---- Tile selection (sublane/lane aligned, clamped to N) -------------- #
    row_tile = int(_round_up(min(row_tile, _round_up(n, 8)), 8))
    k_tile = int(_round_up(min(k_tile, _round_up(n, 128)), 128))

    # Shrink tiles until the double-buffered Stage-2 working set fits the
    # portable VMEM budget (matters for large out_feat / v7x's 64 MiB VMEM).
    while True:
        working_set = (
            2 * row_tile * k_tile * adj_itemsize       # adj blocks
            + 2 * k_tile * out_feat * h_itemsize       # h blocks (streamed)
            + 2 * row_tile * out_feat * 4              # resident f32 out block
        )
        if working_set <= _VMEM_BUDGET_BYTES:
            break
        if k_tile > 512:
            k_tile //= 2
        elif row_tile > 64:
            row_tile //= 2
        else:
            break

    n_row_pad = _round_up(n, row_tile)
    n_k_pad = _round_up(n, k_tile)

    # ---- Zero-pad to tile-aligned N (zeros don't change the matmul) ------- #
    if n_row_pad != n or n_k_pad != n:
        adj_p = jnp.pad(adj, ((0, n_row_pad - n), (0, n_k_pad - n)))
        feat_p = jnp.pad(feat, ((0, n_k_pad - n), (0, 0)))
    else:
        adj_p, feat_p = adj, feat

    # ---- Stage 1: latent projection, row-tiled ----------------------------- #
    proj_tile = k_tile  # divides n_k_pad by construction, multiple of 8
    h = pl.pallas_call(
        _proj_kernel,
        out_shape=jax.ShapeDtypeStruct((n_k_pad, out_feat), h_dtype),
        grid_spec=pltpu.PrefetchScalarGridSpec(
            num_scalar_prefetch=0,
            grid=(n_k_pad // proj_tile,),
            in_specs=[
                pl.BlockSpec((proj_tile, in_feat), lambda i: (i, 0)),
                # W: constant block index -> fetched once, stays resident.
                pl.BlockSpec((in_feat, out_feat), lambda i: (0, 0)),
            ],
            out_specs=pl.BlockSpec((proj_tile, out_feat), lambda i: (i, 0)),
        ),
        compiler_params=pltpu.CompilerParams(
            dimension_semantics=("parallel",),
            vmem_limit_bytes=_VMEM_LIMIT_BYTES,
        ),
    )(feat_p, weight)

    # ---- Stage 2: adjacency aggregation (the HBM-bound part) --------------- #
    grid = (n_row_pad // row_tile, n_k_pad // k_tile)

    if pin_h is None:
        # Pin h resident if (conservatively double-counted) it still fits the
        # budget next to the adj and output blocks.
        base = 2 * row_tile * k_tile * adj_itemsize + 2 * row_tile * out_feat * 4
        pin_h = (base + 2 * n_k_pad * out_feat * h_itemsize) <= _VMEM_BUDGET_BYTES

    if pin_h:
        kernel = functools.partial(_spmm_pinned_kernel, k_tile=k_tile)
        # Constant block index => h DMA'd once for the whole grid.
        h_spec = pl.BlockSpec((n_k_pad, out_feat), lambda i, k: (0, 0))
    else:
        kernel = _spmm_streamed_kernel
        h_spec = pl.BlockSpec((k_tile, out_feat), lambda i, k: (k, 0))

    out = pl.pallas_call(
        kernel,
        out_shape=jax.ShapeDtypeStruct((n_row_pad, out_feat), out_dtype),
        grid_spec=pltpu.PrefetchScalarGridSpec(
            num_scalar_prefetch=0,
            grid=grid,
            in_specs=[
                pl.BlockSpec((row_tile, k_tile), lambda i, k: (i, k)),
                h_spec,
            ],
            # Constant along k -> output block stays resident (accumulator).
            out_specs=pl.BlockSpec((row_tile, out_feat), lambda i, k: (i, 0)),
        ),
        compiler_params=pltpu.CompilerParams(
            # Row tiles are independent -> "parallel" (megacore sharding on
            # v7x, neutral on v5e/v6e); K is a reduction -> "arbitrary".
            dimension_semantics=("parallel", "arbitrary"),
            vmem_limit_bytes=_VMEM_LIMIT_BYTES,
        ),
    )(adj_p, h)

    if n_row_pad != n:
        out = out[:n]
    return out


def xavier_uniform(key, in_feat, out_feat, dtype=jnp.float32):
    """Matches torch.nn.init.xavier_uniform_ (gain=1)."""
    bound = math.sqrt(6.0 / (in_feat + out_feat))
    return jax.random.uniform(
        key, (in_feat, out_feat), dtype=dtype, minval=-bound, maxval=bound
    )


if __name__ == "__main__":
    # Small shapes consistent with the module's forward.
    N = 256         # number of nodes
    IN_FEAT = 64    # latent dimension
    OUT_FEAT = 128  # reconstructed feature dimension

    key = jax.random.PRNGKey(0)
    k_feat, k_adj, k_w, k_adj2 = jax.random.split(key, 4)

    feat = jax.random.normal(k_feat, (N, IN_FEAT), dtype=jnp.float32)
    # Dense "adjacency" (torch.spmm on a dense-equivalent matrix),
    # row-normalized as is typical for GNN adjacency matrices.
    adj = jax.random.uniform(k_adj, (N, N), dtype=jnp.float32)
    adj = adj / jnp.sum(adj, axis=1, keepdims=True)

    weight = xavier_uniform(k_w, IN_FEAT, OUT_FEAT)

    # Pure-JAX reference.
    ref = adj @ (feat @ weight)

    # 1) Default config (large tiles clamp to N; h auto-pinned resident).
    out = jax.block_until_ready(decoder_forward(feat, weight, adj))
    assert out.shape == (N, OUT_FEAT)
    assert jnp.allclose(out, ref, atol=1e-4, rtol=1e-4), "default config mismatch"

    # 2) Explicit multi-tile grid (4 x 2), streamed-h path.
    out2 = jax.block_until_ready(
        decoder_forward(feat, weight, adj, row_tile=64, k_tile=128, pin_h=False)
    )
    assert jnp.allclose(out2, ref, atol=1e-4, rtol=1e-4), "streamed-h mismatch"

    # 3) Non-tile-aligned N (exercises the zero-padding path), pinned h.
    N2 = 200
    feat2 = feat[:N2]
    adj2 = jax.random.uniform(k_adj2, (N2, N2), dtype=jnp.float32)
    adj2 = adj2 / jnp.sum(adj2, axis=1, keepdims=True)
    ref2 = adj2 @ (feat2 @ weight)
    out3 = jax.block_until_ready(
        decoder_forward(feat2, weight, adj2, row_tile=64, k_tile=128, pin_h=True)
    )
    assert out3.shape == (N2, OUT_FEAT)
    assert jnp.allclose(out3, ref2, atol=1e-4, rtol=1e-4), "padded-N mismatch"

    # 4) bf16 h streaming (adj stays f32 — no wrapper cast; h is emitted bf16
    #    directly by Stage 1; accumulation stays f32).
    out4 = jax.block_until_ready(
        decoder_forward(
            feat, weight, adj, row_tile=64, k_tile=128, h_dtype=jnp.bfloat16
        )
    )
    assert jnp.allclose(out4, ref, atol=5e-2, rtol=5e-2), "bf16-h mismatch"

    print("KERNEL_OK")
</pallas_src>

<mosaic_0001>
module attributes {stable_mosaic.version = 11 : i64} {
  func.func @_spmm_pinned_kernel(%arg0: i32, %arg1: i32, %arg2: memref<256x256xf32, #tpu.memory_space<vmem>>, %arg3: memref<256x128xf32, #tpu.memory_space<vmem>>, %arg4: memref<256x128xf32, #tpu.memory_space<vmem>>) attributes {dimension_semantics = [#tpu.dimension_semantics<parallel>, #tpu.dimension_semantics<arbitrary>], iteration_bounds = array<i64: 1, 1>, scalar_prefetch = 0 : i64, scratch_operands = 0 : i64, tpu.core_type = #tpu.core_type<tc>, window_params = [{transform_indices = @transform_0, window_bounds = array<i64: 256, 256>}, {pipeline_mode = #tpu.pipeline_mode<synchronous>, transform_indices = @transform_1, window_bounds = array<i64: 256, 128>}, {transform_indices = @transform_2, window_bounds = array<i64: 256, 128>}]} {
    %c0_i32 = arith.constant 0 : i32
    %0 = arith.cmpi eq, %arg1, %c0_i32 : i32
    %1 = arith.extui %0 : i1 to i32
    %c0_i32_0 = arith.constant 0 : i32
    %2 = arith.cmpi ne, %1, %c0_i32_0 : i32
    scf.if %2 {
      %cst_7 = arith.constant 0.000000e+00 : f32
      %12 = vector.broadcast %cst_7 : f32 to vector<256x128xf32>
      %c0_8 = arith.constant 0 : index
      %c0_9 = arith.constant 0 : index
      %13 = vector.load %arg4[%c0_8, %c0_9] : memref<256x128xf32, #tpu.memory_space<vmem>>, vector<256x128xf32>
      tpu.vector_store %arg4[%c0_8, %c0_9], %12 {strides = array<i32>} : memref<256x128xf32, #tpu.memory_space<vmem>>, vector<256x128xf32>,
    } else {
    }
    %c256_i32 = arith.constant 256 : i32
    %3 = arith.muli %arg1, %c256_i32 : i32
    %4 = tpu.assume_multiple %3, 256 : i32
    %c0 = arith.constant 0 : index
    %c0_1 = arith.constant 0 : index
    %5 = vector.load %arg4[%c0, %c0_1] : memref<256x128xf32, #tpu.memory_space<vmem>>, vector<256x128xf32>
    %c0_2 = arith.constant 0 : index
    %c0_3 = arith.constant 0 : index
    %6 = vector.load %arg2[%c0_2, %c0_3] : memref<256x256xf32, #tpu.memory_space<vmem>>, vector<256x256xf32>
    %7 = arith.index_cast %4 : i32 to index
    %c0_4 = arith.constant 0 : index
    %8 = vector.load %arg3[%7, %c0_4] : memref<256x128xf32, #tpu.memory_space<vmem>>, vector<256x128xf32>
    %cst = arith.constant dense<0.000000e+00> : vector<256x128xf32>
    %9 = tpu.matmul %6, %8, %cst {dimension_numbers = #tpu.dot_dimension_numbers<[1], [0], [0], [1], [0, 0, 1, 1], [], []>} : vector<256x256xf32>, vector<256x128xf32>, vector<256x128xf32> -> vector<256x128xf32>
    %10 = arith.addf %5, %9 : vector<256x128xf32>
    %c0_5 = arith.constant 0 : index
    %c0_6 = arith.constant 0 : index
    %11 = vector.load %arg4[%c0_5, %c0_6] : memref<256x128xf32, #tpu.memory_space<vmem>>, vector<256x128xf32>
    tpu.vector_store %arg4[%c0_5, %c0_6], %10 {strides = array<i32>} : memref<256x128xf32, #tpu.memory_space<vmem>>, vector<256x128xf32>,
    return
  }
  func.func @transform_0(%arg0: i32, %arg1: i32) -> (i32, i32) {
    %c0_i32 = arith.constant 0 : i32
    return %arg0, %arg1 : i32, i32
  }
  func.func @transform_1(%arg0: i32, %arg1: i32) -> (i32, i32) {
    %c0_i32 = arith.constant 0 : i32
    %c0_i32_0 = arith.constant 0 : i32
    %c0_i32_1 = arith.constant 0 : i32
    return %c0_i32, %c0_i32_0 : i32, i32
  }
  func.func @transform_2(%arg0: i32, %arg1: i32) -> (i32, i32) {
    %c0_i32 = arith.constant 0 : i32
    %c0_i32_0 = arith.constant 0 : i32
    return %arg0, %c0_i32 : i32, i32
  }
}

module attributes {stable_mosaic.version = 11 : i64} {
  func.func @_proj_kernel(%arg0: i32, %arg1: memref<256x64xf32, #tpu.memory_space<vmem>>, %arg2: memref<64x128xf32, #tpu.memory_space<vmem>>, %arg3: memref<256x128xf32, #tpu.memory_space<vmem>>) attributes {dimension_semantics = [#tpu.dimension_semantics<parallel>], iteration_bounds = array<i64: 1>, scalar_prefetch = 0 : i64, scratch_operands = 0 : i64, tpu.core_type = #tpu.core_type<tc>, window_params = [{transform_indices = @transform_0, window_bounds = array<i64: 256, 64>}, {pipeline_mode = #tpu.pipeline_mode<synchronous>, transform_indices = @transform_1, window_bounds = array<i64: 64, 128>}, {transform_indices = @transform_2, window_bounds = array<i64: 256, 128>}]} {
    %c0 = arith.constant 0 : index
    %c0_0 = arith.constant 0 : index
    %0 = vector.load %arg1[%c0, %c0_0] : memref<256x64xf32, #tpu.memory_space<vmem>>, vector<256x64xf32>
    %c0_1 = arith.constant 0 : index
    %c0_2 = arith.constant 0 : index
    %1 = vector.load %arg2[%c0_1, %c0_2] : memref<64x128xf32, #tpu.memory_space<vmem>>, vector<64x128xf32>
    %cst = arith.constant dense<0.000000e+00> : vector<256x128xf32>
    %2 = tpu.matmul %0, %1, %cst {dimension_numbers = #tpu.dot_dimension_numbers<[1], [0], [0], [1], [0, 0, 1, 1], [], []>} : vector<256x64xf32>, vector<64x128xf32>, vector<256x128xf32> -> vector<256x128xf32>
    %c0_3 = arith.constant 0 : index
    %c0_4 = arith.constant 0 : index
    %3 = vector.load %arg3[%c0_3, %c0_4] : memref<256x128xf32, #tpu.memory_space<vmem>>, vector<256x128xf32>
    tpu.vector_store %arg3[%c0_3, %c0_4], %2 {strides = array<i32>} : memref<256x128xf32, #tpu.memory_space<vmem>>, vector<256x128xf32>,
    return
  }
  func.func @transform_0(%arg0: i32) -> (i32, i32) {
    %c0_i32 = arith.constant 0 : i32
    %c0_i32_0 = arith.constant 0 : i32
    return %arg0, %c0_i32 : i32, i32
  }
  func.func @transform_1(%arg0: i32) -> (i32, i32) {
    %c0_i32 = arith.constant 0 : i32
    %c0_i32_0 = arith.constant 0 : i32
    %c0_i32_1 = arith.constant 0 : i32
    return %c0_i32, %c0_i32_0 : i32, i32
  }
  func.func @transform_2(%arg0: i32) -> (i32, i32) {
    %c0_i32 = arith.constant 0 : i32
    %c0_i32_0 = arith.constant 0 : i32
    return %arg0, %c0_i32 : i32, i32
  }
}

</mosaic_0001>

<bundles_post_ra>
// kernel: decoder_forward.2
= control target key start
LH: loop header
LB: loop body
LE: loop exit
PB: predicated region body
PF: predicated region fallthrough
CT: control target
= control target key end

     0   :  { %7 = vsyncpa [#allocation3], 0  ;;  %s611_s9 = smov [#allocation2]   ;;  %s865_s0 = inlined_call_operand.vmem [shape: f32[256,64], index: 0, kind: input, shape index: {}]   ;;  %s866_s1 = inlined_call_operand.hbm [shape: f32[64,128], index: 1, kind: input, shape index: {}]   ;;  %s867_s2 = inlined_call_operand.vmem [shape: f32[256,128], index: 2, kind: output, shape index: {}]  }
   0x1   :  { %s15_s10 = sshll.u32 %s611_s9, 4  ;;  %s587_s13 = scalar_lea.hbm %s866_s1, 1024  ;;  %s16_s10 = int_to_ptr.vmem [resolvable:$true] %s15_s10 }
   0x2   :  { %p588_p0 = scmp.ne.s32.totalorder %s866_s1, %s587_s13  ;;  %p591_p1 = scmp.lt.u32.totalorder %s587_s13, %s866_s1 }
   0x4   :  { %p593_p2 = pnand %p591_p1, %p588_p0 }
   0x6   :  { %596 = shalt.err (!%p593_p2)
}
   0x7   :  { %s597_s18 = scalar_lea.vmem %s16_s10, 1024  ;;  %p602_p4 = scmp.lt.s32.totalorder %s16_s10, %s16_s10 }
   0x8   :  { %p598_p3 = scmp.ne.s32.totalorder %s16_s10, %s597_s18  ;;  %p603_p5 = scmp.lt.s32.totalorder %s597_s18, %s597_s18 }
   0xa   :  { %p604_p6 = por %p603_p5, %p602_p4 }
   0xc   :  { %p605_p7 = pnand %p604_p6, %p598_p3 }
   0xe   :  { %608 = shalt.err (!%p605_p7)
}
   0xf   :  { %s612_s19 = smov 128   ;;  %s613_s20 = smov 8  }
  0x10   :  { %21 = dma.hbm_to_vmem [thread:$0]  %s866_s1, 1024, %s16_s10, [#allocation3], %s612_s19, %s612_s19, %s613_s20  }
  0x11   :  { %609 = dma.done.wait [#allocation3], 1024  }
  0x12   :  { %610 = vsyncadd [#allocation3], 4294966272  ;;  %v57_v0 = vld [vmem:[#allocation2] sm:$0xff]  ;;  %v58_v1 = vld [vmem:[#allocation2 + $0x8] sm:$0xff]  ;;  %vm65_vm0 = vcmask 523264  }
  0x13   :  { %v59_v2 = vld [vmem:[#allocation2 + $0x10] sm:$0xff]  ;;  %v560_v3 = vpack.c.bf16 %v58_v1, %v57_v0  ;;  %v60_v4 = vld [vmem:[#allocation2 + $0x18] sm:$0xff]  ;;  %v61_v6 = vld [vmem:[#allocation2 + $0x20] sm:$0xff] }
  0x14   :  { %v564_v5 = vpack.c.bf16 %v60_v4, %v59_v2  ;;  %v62_v7 = vld [vmem:[#allocation2 + $0x28] sm:$0xff]  ;;  %v25_v8 = vld [vmem:[%s865_s0] sm:$0xff]  ;;  %v63_v11 = vld [vmem:[#allocation2 + $0x30] sm:$0xff] }
  0x15   :  { %561 = vmatprep.subr.bf16.mxu0 %v560_v3  ;;  %576 = vmatprep.subr.bf16.mxu1 %v560_v3  ;;  %v41_v9 = vld [vmem:[%s865_s0 + $0x80] sm:$0xff]  ;;  %v568_v10 = vpack.c.bf16 %v62_v7, %v61_v6  ;;  %v64_v12 = vld [vmem:[#allocation2 + $0x38] sm:$0xff]  ;;  %v26_v14 = vld [vmem:[%s865_s0 + $0x8] sm:$0xff] }
  0x16   :  { %563 = vmatpush3.bf16.msra.mxu0 %v560_v3  ;;  %580 = vmatpush3.bf16.msra.mxu1 %v560_v3  ;;  %v572_v13 = vpack.c.bf16 %v64_v12, %v63_v11  ;;  %v42_v15 = vld [vmem:[%s865_s0 + $0x88] sm:$0xff]  ;;  %v27_v16 = vld [vmem:[%s865_s0 + $0x10] sm:$0xff]  ;;  %v28_v18 = vld [vmem:[%s865_s0 + $0x18] sm:$0xff] }
  0x17   :  { %565 = vmatprep.subr.bf16.mxu0 %v564_v5  ;;  %577 = vmatprep.subr.bf16.mxu1 %v564_v5  ;;  %v43_v17 = vld [vmem:[%s865_s0 + $0x90] sm:$0xff]  ;;  %v44_v19 = vld [vmem:[%s865_s0 + $0x98] sm:$0xff]  ;;  %v29_v20 = vld [vmem:[%s865_s0 + $0x20] sm:$0xff] }
  0x18   :  { %512 = vmatprep.mubr.msk.f32.mxu0 %vm65_vm0, %v25_v8  ;;  %536 = vmatprep.mubr.msk.f32.mxu1 %vm65_vm0, %v41_v9  ;;  %v45_v21 = vld [vmem:[%s865_s0 + $0xa0] sm:$0xff]  ;;  %v30_v22 = vld [vmem:[%s865_s0 + $0x28] sm:$0xff]  ;;  %v31_v24 = vld [vmem:[%s865_s0 + $0x30] sm:$0xff] }
  0x19   :  { %v46_v23 = vld [vmem:[%s865_s0 + $0xa8] sm:$0xff]  ;;  %v47_v25 = vld [vmem:[%s865_s0 + $0xb0] sm:$0xff]  ;;  %v32_v26 = vld [vmem:[%s865_s0 + $0x38] sm:$0xff] }
  0x1a   :  { %567 = vmatpush3.bf16.msra.mxu0 %v564_v5  ;;  %581 = vmatpush3.bf16.msra.mxu1 %v564_v5  ;;  %v48_v27 = vld [vmem:[%s865_s0 + $0xb8] sm:$0xff]  ;;  %v33_v28 = vld [vmem:[%s865_s0 + $0x40] sm:$0xff]  ;;  %v34_v30 = vld [vmem:[%s865_s0 + $0x48] sm:$0xff] }
  0x1b   :  { %569 = vmatprep.subr.bf16.mxu0 %v568_v10  ;;  %578 = vmatprep.subr.bf16.mxu1 %v568_v10  ;;  %v49_v29 = vld [vmem:[%s865_s0 + $0xc0] sm:$0xff]  ;;  %v50_v31 = vld [vmem:[%s865_s0 + $0xc8] sm:$0xff]  ;;  %v35_v32 = vld [vmem:[%s865_s0 + $0x50] sm:$0xff] }
  0x1c   :  { %v51_v33 = vld [vmem:[%s865_s0 + $0xd0] sm:$0xff]  ;;  %v36_v34 = vld [vmem:[%s865_s0 + $0x58] sm:$0xff]  ;;  %v37_v36 = vld [vmem:[%s865_s0 + $0x60] sm:$0xff] }
  0x1d   :  { %v52_v35 = vld [vmem:[%s865_s0 + $0xd8] sm:$0xff]  ;;  %v53_v37 = vld [vmem:[%s865_s0 + $0xe0] sm:$0xff]  ;;  %v38_v38 = vld [vmem:[%s865_s0 + $0x68] sm:$0xff] }
  0x1e   :  { %571 = vmatpush3.bf16.msra.mxu0 %v568_v10  ;;  %582 = vmatpush3.bf16.msra.mxu1 %v568_v10  ;;  %v54_v39 = vld [vmem:[%s865_s0 + $0xe8] sm:$0xff]  ;;  %v39_v40 = vld [vmem:[%s865_s0 + $0x70] sm:$0xff]  ;;  %v40_v42 = vld [vmem:[%s865_s0 + $0x78] sm:$0xff] }
  0x1f   :  { %573 = vmatprep.subr.bf16.mxu0 %v572_v13  ;;  %579 = vmatprep.subr.bf16.mxu1 %v572_v13  ;;  %v55_v41 = vld [vmem:[%s865_s0 + $0xf0] sm:$0xff]  ;;  %v56_v43 = vld [vmem:[%s865_s0 + $0xf8] sm:$0xff] }
  0x22   :  { %575 = vmatpush3.bf16.msra.mxu0 %v572_v13  ;;  %583 = vmatpush3.bf16.msra.mxu1 %v572_v13 }
  0x25   :  { %513 = vmatmul.mubr.msk.f32.vlgmr.msra.gmra.mrb[0].mxu0 %vm65_vm0, %v26_v14  ;;  %537 = vmatmul.mubr.msk.f32.vlgmr.msra.gmra.mrb[0].mxu1 %vm65_vm0, %v42_v15 }
  0x26   :  { %515 = vmatprep.mubr.msk.f32.mxu0 %vm65_vm0, %v27_v16  ;;  %539 = vmatprep.mubr.msk.f32.mxu1 %vm65_vm0, %v43_v17 }
  0x29   :  { %516 = vmatmul.mubr.msk.f32.gmra.mrb[2].mxu0 %vm65_vm0, %v28_v18  ;;  %540 = vmatmul.mubr.msk.f32.gmra.mrb[2].mxu1 %vm65_vm0, %v44_v19 }
  0x2a   :  { %518 = vmatprep.mubr.msk.f32.mxu0 %vm65_vm0, %v29_v20  ;;  %542 = vmatprep.mubr.msk.f32.mxu1 %vm65_vm0, %v45_v21 }
  0x2d   :  { %519 = vmatmul.mubr.msk.f32.gmra.mrb[4].mxu0 %vm65_vm0, %v30_v22  ;;  %543 = vmatmul.mubr.msk.f32.gmra.mrb[4].mxu1 %vm65_vm0, %v46_v23 }
  0x2e   :  { %521 = vmatprep.mubr.msk.f32.mxu0 %vm65_vm0, %v31_v24  ;;  %545 = vmatprep.mubr.msk.f32.mxu1 %vm65_vm0, %v47_v25 }
  0x31   :  { %522 = vmatmul.mubr.msk.f32.gmra.mrb[6].mxu0 %vm65_vm0, %v32_v26  ;;  %546 = vmatmul.mubr.msk.f32.gmra.mrb[6].mxu1 %vm65_vm0, %v48_v27 }
  0x32   :  { %524 = vmatprep.mubr.msk.f32.mxu0 %vm65_vm0, %v33_v28  ;;  %548 = vmatprep.mubr.msk.f32.mxu1 %vm65_vm0, %v49_v29 }
  0x35   :  { %525 = vmatmul.mubr.msk.f32.gmra.mrb[8].mxu0 %vm65_vm0, %v34_v30  ;;  %549 = vmatmul.mubr.msk.f32.gmra.mrb[8].mxu1 %vm65_vm0, %v50_v31 }
  0x36   :  { %527 = vmatprep.mubr.msk.f32.mxu0 %vm65_vm0, %v35_v32  ;;  %551 = vmatprep.mubr.msk.f32.mxu1 %vm65_vm0, %v51_v33 }
  0x39   :  { %528 = vmatmul.mubr.msk.f32.gmra.mrb[10].mxu0 %vm65_vm0, %v36_v34  ;;  %552 = vmatmul.mubr.msk.f32.gmra.mrb[10].mxu1 %vm65_vm0, %v52_v35 }
  0x3a   :  { %530 = vmatprep.mubr.msk.f32.mxu0 %vm65_vm0, %v37_v36  ;;  %554 = vmatprep.mubr.msk.f32.mxu1 %vm65_vm0, %v53_v37 }
  0x3d   :  { %531 = vmatmul.mubr.msk.f32.gmra.mrb[12].mxu0 %vm65_vm0, %v38_v38  ;;  %555 = vmatmul.mubr.msk.f32.gmra.mrb[12].mxu1 %vm65_vm0, %v54_v39 }
  0x3e   :  { %533 = vmatprep.mubr.msk.f32.mxu0 %vm65_vm0, %v39_v40  ;;  %557 = vmatprep.mubr.msk.f32.mxu1 %vm65_vm0, %v55_v41 }
  0x41   :  { %534 = vmatmul.mubr.msk.f32.gmra.mrb[14].mxu0 %vm65_vm0, %v40_v42  ;;  %558 = vmatmul.mubr.msk.f32.gmra.mrb[14].mxu1 %vm65_vm0, %v56_v43 }
  0xf8   :  { %v514_v44 = vpop.f32.mrb[0].mxu0  ;;  %v538_v45 = vpop.f32.mrb[0].mxu1 }
  0xf9   :  { %388 = vst [vmem:[%s867_s2 + $0x8] sm:$0xff] %v514_v44  ;;  %404 = vst [vmem:[%s867_s2 + $0x88] sm:$0xff] %v538_v45  ;;  %v228_v46 = vpop.f32.mrb[1].mxu0  ;;  %v308_v47 = vpop.f32.mrb[1].mxu1 }
  0xfa   :  { %387 = vst [vmem:[%s867_s2] sm:$0xff] %v228_v46  ;;  %403 = vst [vmem:[%s867_s2 + $0x80] sm:$0xff] %v308_v47 }
  0xfc   :  { %v517_v48 = vpop.f32.mrb[2].mxu0  ;;  %v541_v49 = vpop.f32.mrb[2].mxu1 }
  0xfd   :  { %390 = vst [vmem:[%s867_s2 + $0x18] sm:$0xff] %v517_v48  ;;  %406 = vst [vmem:[%s867_s2 + $0x98] sm:$0xff] %v541_v49  ;;  %v238_v50 = vpop.f32.mrb[3].mxu0  ;;  %v318_v51 = vpop.f32.mrb[3].mxu1 }
  0xfe   :  { %389 = vst [vmem:[%s867_s2 + $0x10] sm:$0xff] %v238_v50  ;;  %405 = vst [vmem:[%s867_s2 + $0x90] sm:$0xff] %v318_v51 }
 0x100   :  { %v520_v52 = vpop.f32.mrb[4].mxu0  ;;  %v544_v53 = vpop.f32.mrb[4].mxu1 }
 0x101   :  { %392 = vst [vmem:[%s867_s2 + $0x28] sm:$0xff] %v520_v52  ;;  %408 = vst [vmem:[%s867_s2 + $0xa8] sm:$0xff] %v544_v53  ;;  %v248_v54 = vpop.f32.mrb[5].mxu0  ;;  %v328_v55 = vpop.f32.mrb[5].mxu1 }
 0x102   :  { %391 = vst [vmem:[%s867_s2 + $0x20] sm:$0xff] %v248_v54  ;;  %407 = vst [vmem:[%s867_s2 + $0xa0] sm:$0xff] %v328_v55 }
 0x104   :  { %v523_v56 = vpop.f32.mrb[6].mxu0  ;;  %v547_v57 = vpop.f32.mrb[6].mxu1 }
 0x105   :  { %394 = vst [vmem:[%s867_s2 + $0x38] sm:$0xff] %v523_v56  ;;  %410 = vst [vmem:[%s867_s2 + $0xb8] sm:$0xff] %v547_v57  ;;  %v258_v58 = vpop.f32.mrb[7].mxu0  ;;  %v338_v59 = vpop.f32.mrb[7].mxu1 }
 0x106   :  { %393 = vst [vmem:[%s867_s2 + $0x30] sm:$0xff] %v258_v58  ;;  %409 = vst [vmem:[%s867_s2 + $0xb0] sm:$0xff] %v338_v59 }
 0x108   :  { %v526_v60 = vpop.f32.mrb[8].mxu0  ;;  %v550_v61 = vpop.f32.mrb[8].mxu1 }
 0x109   :  { %396 = vst [vmem:[%s867_s2 + $0x48] sm:$0xff] %v526_v60  ;;  %412 = vst [vmem:[%s867_s2 + $0xc8] sm:$0xff] %v550_v61  ;;  %v268_v62 = vpop.f32.mrb[9].mxu0  ;;  %v348_v63 = vpop.f32.mrb[9].mxu1 }
 0x10a   :  { %395 = vst [vmem:[%s867_s2 + $0x40] sm:$0xff] %v268_v62  ;;  %411 = vst [vmem:[%s867_s2 + $0xc0] sm:$0xff] %v348_v63 }
 0x10c   :  { %v529_v0 = vpop.f32.mrb[10].mxu0  ;;  %v553_v1 = vpop.f32.mrb[10].mxu1 }
 0x10d   :  { %398 = vst [vmem:[%s867_s2 + $0x58] sm:$0xff] %v529_v0  ;;  %414 = vst [vmem:[%s867_s2 + $0xd8] sm:$0xff] %v553_v1  ;;  %v278_v2 = vpop.f32.mrb[11].mxu0  ;;  %v358_v3 = vpop.f32.mrb[11].mxu1 }
 0x10e   :  { %397 = vst [vmem:[%s867_s2 + $0x50] sm:$0xff] %v278_v2  ;;  %413 = vst [vmem:[%s867_s2 + $0xd0] sm:$0xff] %v358_v3 }
 0x110   :  { %v532_v4 = vpop.f32.mrb[12].mxu0  ;;  %v556_v5 = vpop.f32.mrb[12].mxu1 }
 0x111   :  { %400 = vst [vmem:[%s867_s2 + $0x68] sm:$0xff] %v532_v4  ;;  %416 = vst [vmem:[%s867_s2 + $0xe8] sm:$0xff] %v556_v5  ;;  %v288_v6 = vpop.f32.mrb[13].mxu0  ;;  %v368_v7 = vpop.f32.mrb[13].mxu1 }
 0x112   :  { %399 = vst [vmem:[%s867_s2 + $0x60] sm:$0xff] %v288_v6  ;;  %415 = vst [vmem:[%s867_s2 + $0xe0] sm:$0xff] %v368_v7 }
 0x114   :  { %v535_v8 = vpop.f32.mrb[14].mxu0  ;;  %v559_v9 = vpop.f32.mrb[14].mxu1 }
 0x115   :  { %402 = vst [vmem:[%s867_s2 + $0x78] sm:$0xff] %v535_v8  ;;  %418 = vst [vmem:[%s867_s2 + $0xf8] sm:$0xff] %v559_v9  ;;  %v298_v10 = vpop.f32.mrb[15].mxu0  ;;  %v378_v11 = vpop.f32.mrb[15].mxu1 }
 0x116   :  { %401 = vst [vmem:[%s867_s2 + $0x70] sm:$0xff] %v298_v10  ;;  %417 = vst [vmem:[%s867_s2 + $0xf0] sm:$0xff] %v378_v11 }
 0x117   :  { %423 = vsyncpa [#allocation3], 1 }

// kernel: decoder_forward.3
= control target key start
LH: loop header
LB: loop body
LE: loop exit
PB: predicated region body
PF: predicated region fallthrough
CT: control target
= control target key end

     0   :  { %v592_v3 = vmov 0.0|0.0   ;;  %s943_s0 = inlined_call_operand.vmem [shape: f32[256,256], index: 0, kind: input, shape index: {}]   ;;  %s944_s1 = inlined_call_operand.vmem [shape: f32[256,128], index: 1, kind: input, shape index: {}]   ;;  %s945_s2 = inlined_call_operand.hbm [shape: f32[256,128], index: 2, kind: output, shape index: {}]  }
   0x1   :  { %v146_v0 = vld [vmem:[%s944_s1] sm:$0xff]  ;;  %v147_v1 = vld [vmem:[%s944_s1 + $0x8] sm:$0xff]  ;;  %v148_v2 = vld [vmem:[%s944_s1 + $0x10] sm:$0xff]  ;;  %483 = vmatprep.subr.bf16.mxu0 %v592_v3  ;;  %531 = vmatprep.subr.bf16.mxu1 %v592_v3 }
   0x2   :  { %v484_v4 = vpack.c.bf16 %v147_v1, %v146_v0  ;;  %v149_v5 = vld [vmem:[%s944_s1 + $0x18] sm:$0xff]  ;;  %v150_v7 = vld [vmem:[%s944_s1 + $0x20] sm:$0xff]  ;;  %v151_v8 = vld [vmem:[%s944_s1 + $0x28] sm:$0xff] }
   0x3   :  { %v487_v6 = vpack.c.bf16 %v149_v5, %v148_v2  ;;  %v490_v9 = vpack.c.bf16 %v151_v8, %v150_v7  ;;  %v152_v10 = vld [vmem:[%s944_s1 + $0x30] sm:$0xff]  ;;  %v153_v11 = vld [vmem:[%s944_s1 + $0x38] sm:$0xff]  ;;  %v82_v12 = vld [vmem:[%s943_s0 + $0x8] sm:$0xff] }
   0x4   :  { %485 = vmatpush1.bf16.msra.mxu0 %v484_v4  ;;  %547 = vmatpush1.bf16.msra.mxu1 %v484_v4  ;;  %v493_v13 = vpack.c.bf16 %v153_v11, %v152_v10  ;;  %v114_v14 = vld [vmem:[%s943_s0 + $0x108] sm:$0xff]  ;;  %v154_v15 = vld [vmem:[%s944_s1 + $0x40] sm:$0xff]  ;;  %v156_v18 = vld [vmem:[%s944_s1 + $0x50] sm:$0xff] }
   0x5   :  { %486 = vmatprep.subr.bf16.mxu0 %v592_v3  ;;  %532 = vmatprep.subr.bf16.mxu1 %v592_v3  ;;  %v155_v16 = vld [vmem:[%s944_s1 + $0x48] sm:$0xff]  ;;  %v157_v19 = vld [vmem:[%s944_s1 + $0x58] sm:$0xff]  ;;  %v158_v21 = vld [vmem:[%s944_s1 + $0x60] sm:$0xff] }
   0x6   :  { %242 = vmatprep.mubr.f32.mxu0 %v82_v12  ;;  %322 = vmatprep.mubr.f32.mxu1 %v114_v14  ;;  %v496_v17 = vpack.c.bf16 %v155_v16, %v154_v15  ;;  %v499_v20 = vpack.c.bf16 %v157_v19, %v156_v18  ;;  %v159_v22 = vld [vmem:[%s944_s1 + $0x68] sm:$0xff]  ;;  %v160_v24 = vld [vmem:[%s944_s1 + $0x70] sm:$0xff]  ;;  %v161_v25 = vld [vmem:[%s944_s1 + $0x78] sm:$0xff] }
   0x7   :  { %v502_v23 = vpack.c.bf16 %v159_v22, %v158_v21  ;;  %v505_v26 = vpack.c.bf16 %v161_v25, %v160_v24  ;;  %v162_v27 = vld [vmem:[%s944_s1 + $0x80] sm:$0xff]  ;;  %v163_v28 = vld [vmem:[%s944_s1 + $0x88] sm:$0xff]  ;;  %v164_v30 = vld [vmem:[%s944_s1 + $0x90] sm:$0xff] }
   0x8   :  { %488 = vmatpush1.bf16.msra.mxu0 %v487_v6  ;;  %548 = vmatpush1.bf16.msra.mxu1 %v487_v6  ;;  %v508_v29 = vpack.c.bf16 %v163_v28, %v162_v27  ;;  %v165_v31 = vld [vmem:[%s944_s1 + $0x98] sm:$0xff] }
   0x9   :  { %489 = vmatprep.subr.bf16.mxu0 %v592_v3  ;;  %533 = vmatprep.subr.bf16.mxu1 %v592_v3 }
   0xc   :  { %491 = vmatpush1.bf16.msra.mxu0 %v490_v9  ;;  %549 = vmatpush1.bf16.msra.mxu1 %v490_v9 }
   0xd   :  { %492 = vmatprep.subr.bf16.mxu0 %v592_v3  ;;  %534 = vmatprep.subr.bf16.mxu1 %v592_v3 }
  0x10   :  { %494 = vmatpush1.bf16.msra.mxu0 %v493_v13  ;;  %550 = vmatpush1.bf16.msra.mxu1 %v493_v13 }
  0x11   :  { %495 = vmatprep.subr.bf16.mxu0 %v592_v3  ;;  %535 = vmatprep.subr.bf16.mxu1 %v592_v3 }
  0x14   :  { %497 = vmatpush1.bf16.msra.mxu0 %v496_v17  ;;  %551 = vmatpush1.bf16.msra.mxu1 %v496_v17 }
  0x15   :  { %498 = vmatprep.subr.bf16.mxu0 %v592_v3  ;;  %536 = vmatprep.subr.bf16.mxu1 %v592_v3 }
  0x18   :  { %500 = vmatpush1.bf16.msra.mxu0 %v499_v20  ;;  %552 = vmatpush1.bf16.msra.mxu1 %v499_v20 }
  0x19   :  { %501 = vmatprep.subr.bf16.mxu0 %v592_v3  ;;  %537 = vmatprep.subr.bf16.mxu1 %v592_v3 }
  0x1c   :  { %503 = vmatpush1.bf16.msra.mxu0 %v502_v23  ;;  %553 = vmatpush1.bf16.msra.mxu1 %v502_v23 }
  0x1d   :  { %504 = vmatprep.subr.bf16.mxu0 %v592_v3  ;;  %538 = vmatprep.subr.bf16.mxu1 %v592_v3 }
  0x20   :  { %506 = vmatpush1.bf16.msra.mxu0 %v505_v26  ;;  %554 = vmatpush1.bf16.msra.mxu1 %v505_v26 }
  0x21   :  { %507 = vmatprep.subr.bf16.mxu0 %v592_v3  ;;  %539 = vmatprep.subr.bf16.mxu1 %v592_v3 }
  0x22   :  { %7 = vsyncpa [#allocation3], 0  ;;  %v511_v32 = vpack.c.bf16 %v165_v31, %v164_v30  ;;  %v166_v33 = vld [vmem:[%s944_s1 + $0xa0] sm:$0xff]  ;;  %v167_v34 = vld [vmem:[%s944_s1 + $0xa8] sm:$0xff] }
  0x23   :  { %v514_v35 = vpack.c.bf16 %v167_v34, %v166_v33  ;;  %v168_v36 = vld [vmem:[%s944_s1 + $0xb0] sm:$0xff]  ;;  %v169_v37 = vld [vmem:[%s944_s1 + $0xb8] sm:$0xff]  ;;  %v170_v39 = vld [vmem:[%s944_s1 + $0xc0] sm:$0xff] }
  0x24   :  { %509 = vmatpush1.bf16.msra.mxu0 %v508_v29  ;;  %555 = vmatpush1.bf16.msra.mxu1 %v508_v29  ;;  %v517_v38 = vpack.c.bf16 %v169_v37, %v168_v36  ;;  %v171_v40 = vld [vmem:[%s944_s1 + $0xc8] sm:$0xff]  ;;  %v172_v42 = vld [vmem:[%s944_s1 + $0xd0] sm:$0xff]  ;;  %v173_v43 = vld [vmem:[%s944_s1 + $0xd8] sm:$0xff] }
  0x25   :  { %510 = vmatprep.subr.bf16.mxu0 %v592_v3  ;;  %540 = vmatprep.subr.bf16.mxu1 %v592_v3  ;;  %v520_v41 = vpack.c.bf16 %v171_v40, %v170_v39  ;;  %v523_v44 = vpack.c.bf16 %v173_v43, %v172_v42  ;;  %v174_v45 = vld [vmem:[%s944_s1 + $0xe0] sm:$0xff]  ;;  %v175_v46 = vld [vmem:[%s944_s1 + $0xe8] sm:$0xff]  ;;  %v176_v48 = vld [vmem:[%s944_s1 + $0xf0] sm:$0xff] }
  0x26   :  { %v526_v47 = vpack.c.bf16 %v175_v46, %v174_v45  ;;  %v177_v49 = vld [vmem:[%s944_s1 + $0xf8] sm:$0xff]  ;;  %v81_v51 = vld [vmem:[%s943_s0] sm:$0xff]  ;;  %v83_v55 = vld [vmem:[%s943_s0 + $0x10] sm:$0xff] }
  0x27   :  { %v529_v50 = vpack.c.bf16 %v177_v49, %v176_v48  ;;  %v113_v52 = vld [vmem:[%s943_s0 + $0x100] sm:$0xff]  ;;  %v84_v53 = vld [vmem:[%s943_s0 + $0x18] sm:$0xff]  ;;  %v115_v56 = vld [vmem:[%s943_s0 + $0x110] sm:$0xff] }
  0x28   :  { %512 = vmatpush1.bf16.msra.mxu0 %v511_v32  ;;  %556 = vmatpush1.bf16.msra.mxu1 %v511_v32  ;;  %v116_v54 = vld [vmem:[%s943_s0 + $0x118] sm:$0xff]  ;;  %v86_v57 = vld [vmem:[%s943_s0 + $0x28] sm:$0xff]  ;;  %v85_v59 = vld [vmem:[%s943_s0 + $0x20] sm:$0xff] }
  0x29   :  { %513 = vmatprep.subr.bf16.mxu0 %v592_v3  ;;  %541 = vmatprep.subr.bf16.mxu1 %v592_v3  ;;  %v118_v58 = vld [vmem:[%s943_s0 + $0x128] sm:$0xff]  ;;  %v117_v60 = vld [vmem:[%s943_s0 + $0x120] sm:$0xff]  ;;  %v88_v61 = vld [vmem:[%s943_s0 + $0x38] sm:$0xff] }
  0x2a   :  { %v120_v62 = vld [vmem:[%s943_s0 + $0x138] sm:$0xff]  ;;  %v87_v63 = vld [vmem:[%s943_s0 + $0x30] sm:$0xff]  ;;  %v90_v1 = vld [vmem:[%s943_s0 + $0x48] sm:$0xff] }
  0x2b   :  { %v119_v0 = vld [vmem:[%s943_s0 + $0x130] sm:$0xff]  ;;  %v122_v2 = vld [vmem:[%s943_s0 + $0x148] sm:$0xff]  ;;  %v121_v4 = vld [vmem:[%s943_s0 + $0x140] sm:$0xff] }
  0x2c   :  { %515 = vmatpush1.bf16.msra.mxu0 %v514_v35  ;;  %557 = vmatpush1.bf16.msra.mxu1 %v514_v35  ;;  %v92_v5 = vld [vmem:[%s943_s0 + $0x58] sm:$0xff]  ;;  %v91_v7 = vld [vmem:[%s943_s0 + $0x50] sm:$0xff]  ;;  %v94_v9 = vld [vmem:[%s943_s0 + $0x68] sm:$0xff] }
  0x2d   :  { %516 = vmatprep.subr.bf16.mxu0 %v592_v3  ;;  %542 = vmatprep.subr.bf16.mxu1 %v592_v3  ;;  %v124_v6 = vld [vmem:[%s943_s0 + $0x158] sm:$0xff]  ;;  %v123_v8 = vld [vmem:[%s943_s0 + $0x150] sm:$0xff]  ;;  %v126_v10 = vld [vmem:[%s943_s0 + $0x168] sm:$0xff] }
  0x2e   :  { %v93_v11 = vld [vmem:[%s943_s0 + $0x60] sm:$0xff]  ;;  %v96_v13 = vld [vmem:[%s943_s0 + $0x78] sm:$0xff]  ;;  %v95_v15 = vld [vmem:[%s943_s0 + $0x70] sm:$0xff] }
  0x2f   :  { %v125_v12 = vld [vmem:[%s943_s0 + $0x160] sm:$0xff]  ;;  %v128_v14 = vld [vmem:[%s943_s0 + $0x178] sm:$0xff]  ;;  %v127_v16 = vld [vmem:[%s943_s0 + $0x170] sm:$0xff] }
  0x30   :  { %518 = vmatpush1.bf16.msra.mxu0 %v517_v38  ;;  %558 = vmatpush1.bf16.msra.mxu1 %v517_v38  ;;  %v98_v17 = vld [vmem:[%s943_s0 + $0x88] sm:$0xff]  ;;  %v97_v19 = vld [vmem:[%s943_s0 + $0x80] sm:$0xff]  ;;  %v100_v21 = vld [vmem:[%s943_s0 + $0x98] sm:$0xff] }
  0x31   :  { %519 = vmatprep.subr.bf16.mxu0 %v592_v3  ;;  %543 = vmatprep.subr.bf16.mxu1 %v592_v3  ;;  %v130_v18 = vld [vmem:[%s943_s0 + $0x188] sm:$0xff]  ;;  %v129_v20 = vld [vmem:[%s943_s0 + $0x180] sm:$0xff]  ;;  %v132_v22 = vld [vmem:[%s943_s0 + $0x198] sm:$0xff] }
  0x32   :  { %v99_v23 = vld [vmem:[%s943_s0 + $0x90] sm:$0xff]  ;;  %v102_v25 = vld [vmem:[%s943_s0 + $0xa8] sm:$0xff]  ;;  %v101_v27 = vld [vmem:[%s943_s0 + $0xa0] sm:$0xff] }
  0x33   :  { %v131_v24 = vld [vmem:[%s943_s0 + $0x190] sm:$0xff]  ;;  %v134_v26 = vld [vmem:[%s943_s0 + $0x1a8] sm:$0xff]  ;;  %v133_v28 = vld [vmem:[%s943_s0 + $0x1a0] sm:$0xff] }
  0x34   :  { %521 = vmatpush1.bf16.msra.mxu0 %v520_v41  ;;  %559 = vmatpush1.bf16.msra.mxu1 %v520_v41  ;;  %v104_v29 = vld [vmem:[%s943_s0 + $0xb8] sm:$0xff]  ;;  %v103_v31 = vld [vmem:[%s943_s0 + $0xb0] sm:$0xff]  ;;  %v106_v33 = vld [vmem:[%s943_s0 + $0xc8] sm:$0xff] }
  0x35   :  { %522 = vmatprep.subr.bf16.mxu0 %v592_v3  ;;  %544 = vmatprep.subr.bf16.mxu1 %v592_v3  ;;  %v136_v30 = vld [vmem:[%s943_s0 + $0x1b8] sm:$0xff]  ;;  %v135_v32 = vld [vmem:[%s943_s0 + $0x1b0] sm:$0xff]  ;;  %v138_v34 = vld [vmem:[%s943_s0 + $0x1c8] sm:$0xff] }
  0x36   :  { %v105_v35 = vld [vmem:[%s943_s0 + $0xc0] sm:$0xff]  ;;  %v108_v37 = vld [vmem:[%s943_s0 + $0xd8] sm:$0xff]  ;;  %v107_v39 = vld [vmem:[%s943_s0 + $0xd0] sm:$0xff] }
  0x37   :  { %v137_v36 = vld [vmem:[%s943_s0 + $0x1c0] sm:$0xff]  ;;  %v140_v38 = vld [vmem:[%s943_s0 + $0x1d8] sm:$0xff]  ;;  %v139_v40 = vld [vmem:[%s943_s0 + $0x1d0] sm:$0xff] }
  0x38   :  { %524 = vmatpush1.bf16.msra.mxu0 %v523_v44  ;;  %560 = vmatpush1.bf16.msra.mxu1 %v523_v44  ;;  %v110_v41 = vld [vmem:[%s943_s0 + $0xe8] sm:$0xff]  ;;  %v109_v43 = vld [vmem:[%s943_s0 + $0xe0] sm:$0xff]  ;;  %v112_v45 = vld [vmem:[%s943_s0 + $0xf8] sm:$0xff] }
  0x39   :  { %525 = vmatprep.subr.bf16.mxu0 %v592_v3  ;;  %545 = vmatprep.subr.bf16.mxu1 %v592_v3  ;;  %v142_v42 = vld [vmem:[%s943_s0 + $0x1e8] sm:$0xff]  ;;  %v141_v44 = vld [vmem:[%s943_s0 + $0x1e0] sm:$0xff]  ;;  %v144_v46 = vld [vmem:[%s943_s0 + $0x1f8] sm:$0xff] }
  0x3a   :  { %v143_v48 = vld [vmem:[%s943_s0 + $0x1f0] sm:$0xff] }
  0x3c   :  { %527 = vmatpush1.bf16.msra.mxu0 %v526_v47  ;;  %561 = vmatpush1.bf16.msra.mxu1 %v526_v47  ;;  %v111_v47 = vld [vmem:[%s943_s0 + $0xf0] sm:$0xff] }
  0x3d   :  { %528 = vmatprep.subr.bf16.mxu0 %v592_v3  ;;  %546 = vmatprep.subr.bf16.mxu1 %v592_v3  ;;  %v89_v3 = vld [vmem:[%s943_s0 + $0x40] sm:$0xff]  ;;  %s593_s0 = smov [#allocation2]  }
  0x3e   :  { %s472_s28 = sshll.u32 %s593_s0, 4  ;;  %s473_s28 = int_to_ptr.vmem [resolvable:$true] %s472_s28 }
  0x3f   :  { %s568_s29 = scalar_lea.vmem %s473_s28, 4096  ;;  %p573_p1 = scmp.lt.s32.totalorder %s473_s28, %s473_s28 }
  0x40   :  { %530 = vmatpush1.bf16.msra.mxu0 %v529_v50  ;;  %562 = vmatpush1.bf16.msra.mxu1 %v529_v50  ;;  %p569_p0 = scmp.ne.s32.totalorder %s473_s28, %s568_s29  ;;  %p574_p2 = scmp.lt.s32.totalorder %s568_s29, %s568_s29 }
  0x42   :  { %p575_p3 = por %p574_p2, %p573_p1 }
  0x43   :  { %243 = vmatmul.mubr.f32.vlgmr.msra.gmra.mrb[0].mxu0 %v81_v51  ;;  %323 = vmatmul.mubr.f32.vlgmr.msra.gmra.mrb[0].mxu1 %v113_v52 }
  0x44   :  { %247 = vmatprep.mubr.f32.mxu0 %v84_v53  ;;  %327 = vmatprep.mubr.f32.mxu1 %v116_v54  ;;  %p576_p4 = pnand %p575_p3, %p569_p0 }
  0x47   :  { %248 = vmatmul.mubr.f32.gmra.mrb[2].mxu0 %v83_v55  ;;  %328 = vmatmul.mubr.f32.gmra.mrb[2].mxu1 %v115_v56 }
  0x48   :  { %252 = vmatprep.mubr.f32.mxu0 %v86_v57  ;;  %332 = vmatprep.mubr.f32.mxu1 %v118_v58 }
  0x4b   :  { %253 = vmatmul.mubr.f32.gmra.mrb[4].mxu0 %v85_v59  ;;  %333 = vmatmul.mubr.f32.gmra.mrb[4].mxu1 %v117_v60 }
  0x4c   :  { %257 = vmatprep.mubr.f32.mxu0 %v88_v61  ;;  %337 = vmatprep.mubr.f32.mxu1 %v120_v62 }
  0x4f   :  { %258 = vmatmul.mubr.f32.gmra.mrb[6].mxu0 %v87_v63  ;;  %338 = vmatmul.mubr.f32.gmra.mrb[6].mxu1 %v119_v0 }
  0x50   :  { %262 = vmatprep.mubr.f32.mxu0 %v90_v1  ;;  %342 = vmatprep.mubr.f32.mxu1 %v122_v2 }
  0x53   :  { %263 = vmatmul.mubr.f32.gmra.mrb[8].mxu0 %v89_v3  ;;  %343 = vmatmul.mubr.f32.gmra.mrb[8].mxu1 %v121_v4 }
  0x54   :  { %267 = vmatprep.mubr.f32.mxu0 %v92_v5  ;;  %347 = vmatprep.mubr.f32.mxu1 %v124_v6 }
  0x57   :  { %268 = vmatmul.mubr.f32.gmra.mrb[10].mxu0 %v91_v7  ;;  %348 = vmatmul.mubr.f32.gmra.mrb[10].mxu1 %v123_v8 }
  0x58   :  { %272 = vmatprep.mubr.f32.mxu0 %v94_v9  ;;  %352 = vmatprep.mubr.f32.mxu1 %v126_v10 }
  0x5b   :  { %273 = vmatmul.mubr.f32.gmra.mrb[12].mxu0 %v93_v11  ;;  %353 = vmatmul.mubr.f32.gmra.mrb[12].mxu1 %v125_v12 }
  0x5c   :  { %277 = vmatprep.mubr.f32.mxu0 %v96_v13  ;;  %357 = vmatprep.mubr.f32.mxu1 %v128_v14 }
  0x5f   :  { %278 = vmatmul.mubr.f32.gmra.mrb[14].mxu0 %v95_v15  ;;  %358 = vmatmul.mubr.f32.gmra.mrb[14].mxu1 %v127_v16 }
  0x60   :  { %282 = vmatprep.mubr.f32.mxu0 %v98_v17  ;;  %362 = vmatprep.mubr.f32.mxu1 %v130_v18 }
  0x63   :  { %283 = vmatmul.mubr.f32.gmra.mrb[16].mxu0 %v97_v19  ;;  %363 = vmatmul.mubr.f32.gmra.mrb[16].mxu1 %v129_v20 }
  0x64   :  { %287 = vmatprep.mubr.f32.mxu0 %v100_v21  ;;  %367 = vmatprep.mubr.f32.mxu1 %v132_v22 }
  0x67   :  { %288 = vmatmul.mubr.f32.gmra.mrb[18].mxu0 %v99_v23  ;;  %368 = vmatmul.mubr.f32.gmra.mrb[18].mxu1 %v131_v24 }
  0x68   :  { %292 = vmatprep.mubr.f32.mxu0 %v102_v25  ;;  %372 = vmatprep.mubr.f32.mxu1 %v134_v26 }
  0x6b   :  { %293 = vmatmul.mubr.f32.gmra.mrb[20].mxu0 %v101_v27  ;;  %373 = vmatmul.mubr.f32.gmra.mrb[20].mxu1 %v133_v28 }
  0x6c   :  { %297 = vmatprep.mubr.f32.mxu0 %v104_v29  ;;  %377 = vmatprep.mubr.f32.mxu1 %v136_v30 }
  0x6f   :  { %298 = vmatmul.mubr.f32.gmra.mrb[22].mxu0 %v103_v31  ;;  %378 = vmatmul.mubr.f32.gmra.mrb[22].mxu1 %v135_v32 }
  0x70   :  { %302 = vmatprep.mubr.f32.mxu0 %v106_v33  ;;  %382 = vmatprep.mubr.f32.mxu1 %v138_v34 }
  0x73   :  { %303 = vmatmul.mubr.f32.gmra.mrb[24].mxu0 %v105_v35  ;;  %383 = vmatmul.mubr.f32.gmra.mrb[24].mxu1 %v137_v36 }
  0x74   :  { %307 = vmatprep.mubr.f32.mxu0 %v108_v37  ;;  %387 = vmatprep.mubr.f32.mxu1 %v140_v38 }
  0x77   :  { %308 = vmatmul.mubr.f32.gmra.mrb[26].mxu0 %v107_v39  ;;  %388 = vmatmul.mubr.f32.gmra.mrb[26].mxu1 %v139_v40 }
  0x78   :  { %312 = vmatprep.mubr.f32.mxu0 %v110_v41  ;;  %392 = vmatprep.mubr.f32.mxu1 %v142_v42 }
  0x7b   :  { %313 = vmatmul.mubr.f32.gmra.mrb[28].mxu0 %v109_v43  ;;  %393 = vmatmul.mubr.f32.gmra.mrb[28].mxu1 %v141_v44 }
  0x7c   :  { %317 = vmatprep.mubr.f32.mxu0 %v112_v45  ;;  %397 = vmatprep.mubr.f32.mxu1 %v144_v46 }
  0x7f   :  { %318 = vmatmul.mubr.f32.gmra.mrb[30].mxu0 %v111_v47  ;;  %398 = vmatmul.mubr.f32.gmra.mrb[30].mxu1 %v143_v48 }
 0x116   :  { %v244_v49 = vpop.f32.mrb[0].mxu0  ;;  %v324_v50 = vpop.f32.mrb[0].mxu1 }
 0x117   :  { %v246_v51 = vpop.f32.mrb[1].mxu0  ;;  %v326_v52 = vpop.f32.mrb[1].mxu1  ;;  %435 = vst [vmem:[#allocation2] sm:$0xff] %v244_v49  ;;  %451 = vst [vmem:[#allocation2 + $0x80] sm:$0xff] %v324_v50 }
 0x11a   :  { %v249_v53 = vpop.f32.mrb[2].mxu0  ;;  %v329_v54 = vpop.f32.mrb[2].mxu1 }
 0x11b   :  { %v251_v55 = vpop.f32.mrb[3].mxu0  ;;  %v331_v56 = vpop.f32.mrb[3].mxu1  ;;  %436 = vst [vmem:[#allocation2 + $0x8] sm:$0xff] %v249_v53  ;;  %452 = vst [vmem:[#allocation2 + $0x88] sm:$0xff] %v329_v54 }
 0x11e   :  { %v254_v57 = vpop.f32.mrb[4].mxu0  ;;  %v334_v58 = vpop.f32.mrb[4].mxu1 }
 0x11f   :  { %v256_v59 = vpop.f32.mrb[5].mxu0  ;;  %v336_v60 = vpop.f32.mrb[5].mxu1  ;;  %437 = vst [vmem:[#allocation2 + $0x10] sm:$0xff] %v254_v57  ;;  %453 = vst [vmem:[#allocation2 + $0x90] sm:$0xff] %v334_v58 }
 0x122   :  { %v259_v61 = vpop.f32.mrb[6].mxu0  ;;  %v339_v62 = vpop.f32.mrb[6].mxu1 }
 0x123   :  { %v261_v63 = vpop.f32.mrb[7].mxu0  ;;  %v341_v0 = vpop.f32.mrb[7].mxu1  ;;  %438 = vst [vmem:[#allocation2 + $0x18] sm:$0xff] %v259_v61  ;;  %454 = vst [vmem:[#allocation2 + $0x98] sm:$0xff] %v339_v62 }
 0x126   :  { %v264_v1 = vpop.f32.mrb[8].mxu0  ;;  %v344_v2 = vpop.f32.mrb[8].mxu1 }
 0x127   :  { %v266_v3 = vpop.f32.mrb[9].mxu0  ;;  %v346_v4 = vpop.f32.mrb[9].mxu1  ;;  %439 = vst [vmem:[#allocation2 + $0x20] sm:$0xff] %v264_v1  ;;  %455 = vst [vmem:[#allocation2 + $0xa0] sm:$0xff] %v344_v2 }
 0x12a   :  { %v269_v5 = vpop.f32.mrb[10].mxu0  ;;  %v349_v6 = vpop.f32.mrb[10].mxu1 }
 0x12b   :  { %v271_v7 = vpop.f32.mrb[11].mxu0  ;;  %v351_v8 = vpop.f32.mrb[11].mxu1  ;;  %440 = vst [vmem:[#allocation2 + $0x28] sm:$0xff] %v269_v5  ;;  %456 = vst [vmem:[#allocation2 + $0xa8] sm:$0xff] %v349_v6 }
 0x12e   :  { %v274_v9 = vpop.f32.mrb[12].mxu0  ;;  %v354_v10 = vpop.f32.mrb[12].mxu1 }
 0x12f   :  { %v276_v11 = vpop.f32.mrb[13].mxu0  ;;  %v356_v12 = vpop.f32.mrb[13].mxu1  ;;  %441 = vst [vmem:[#allocation2 + $0x30] sm:$0xff] %v274_v9  ;;  %457 = vst [vmem:[#allocation2 + $0xb0] sm:$0xff] %v354_v10 }
 0x132   :  { %v279_v13 = vpop.f32.mrb[14].mxu0  ;;  %v359_v14 = vpop.f32.mrb[14].mxu1 }
 0x133   :  { %v281_v15 = vpop.f32.mrb[15].mxu0  ;;  %v361_v16 = vpop.f32.mrb[15].mxu1  ;;  %442 = vst [vmem:[#allocation2 + $0x38] sm:$0xff] %v279_v13  ;;  %458 = vst [vmem:[#allocation2 + $0xb8] sm:$0xff] %v359_v14 }
 0x136   :  { %v284_v17 = vpop.f32.mrb[16].mxu0  ;;  %v364_v18 = vpop.f32.mrb[16].mxu1 }
 0x137   :  { %v286_v19 = vpop.f32.mrb[17].mxu0  ;;  %v366_v20 = vpop.f32.mrb[17].mxu1  ;;  %443 = vst [vmem:[#allocation2 + $0x40] sm:$0xff] %v284_v17  ;;  %459 = vst [vmem:[#allocation2 + $0xc0] sm:$0xff] %v364_v18 }
 0x13a   :  { %v289_v21 = vpop.f32.mrb[18].mxu0  ;;  %v369_v22 = vpop.f32.mrb[18].mxu1 }
 0x13b   :  { %v291_v23 = vpop.f32.mrb[19].mxu0  ;;  %v371_v24 = vpop.f32.mrb[19].mxu1  ;;  %444 = vst [vmem:[#allocation2 + $0x48] sm:$0xff] %v289_v21  ;;  %460 = vst [vmem:[#allocation2 + $0xc8] sm:$0xff] %v369_v22 }
 0x13e   :  { %v294_v25 = vpop.f32.mrb[20].mxu0  ;;  %v374_v26 = vpop.f32.mrb[20].mxu1 }
 0x13f   :  { %v296_v27 = vpop.f32.mrb[21].mxu0  ;;  %v376_v28 = vpop.f32.mrb[21].mxu1  ;;  %445 = vst [vmem:[#allocation2 + $0x50] sm:$0xff] %v294_v25  ;;  %461 = vst [vmem:[#allocation2 + $0xd0] sm:$0xff] %v374_v26 }
 0x142   :  { %v299_v29 = vpop.f32.mrb[22].mxu0  ;;  %v379_v30 = vpop.f32.mrb[22].mxu1 }
 0x143   :  { %v301_v31 = vpop.f32.mrb[23].mxu0  ;;  %v381_v32 = vpop.f32.mrb[23].mxu1  ;;  %446 = vst [vmem:[#allocation2 + $0x58] sm:$0xff] %v299_v29  ;;  %462 = vst [vmem:[#allocation2 + $0xd8] sm:$0xff] %v379_v30 }
 0x146   :  { %v304_v33 = vpop.f32.mrb[24].mxu0  ;;  %v384_v34 = vpop.f32.mrb[24].mxu1 }
 0x147   :  { %v306_v35 = vpop.f32.mrb[25].mxu0  ;;  %v386_v36 = vpop.f32.mrb[25].mxu1  ;;  %447 = vst [vmem:[#allocation2 + $0x60] sm:$0xff] %v304_v33  ;;  %463 = vst [vmem:[#allocation2 + $0xe0] sm:$0xff] %v384_v34 }
 0x14a   :  { %v309_v37 = vpop.f32.mrb[26].mxu0  ;;  %v389_v38 = vpop.f32.mrb[26].mxu1 }
 0x14b   :  { %v311_v39 = vpop.f32.mrb[27].mxu0  ;;  %v391_v40 = vpop.f32.mrb[27].mxu1  ;;  %448 = vst [vmem:[#allocation2 + $0x68] sm:$0xff] %v309_v37  ;;  %464 = vst [vmem:[#allocation2 + $0xe8] sm:$0xff] %v389_v38 }
 0x14e   :  { %v314_v41 = vpop.f32.mrb[28].mxu0  ;;  %v394_v42 = vpop.f32.mrb[28].mxu1 }
 0x14f   :  { %v316_v43 = vpop.f32.mrb[29].mxu0  ;;  %v396_v44 = vpop.f32.mrb[29].mxu1  ;;  %449 = vst [vmem:[#allocation2 + $0x70] sm:$0xff] %v314_v41  ;;  %465 = vst [vmem:[#allocation2 + $0xf0] sm:$0xff] %v394_v42 }
 0x152   :  { %v319_v45 = vpop.f32.mrb[30].mxu0  ;;  %v399_v46 = vpop.f32.mrb[30].mxu1 }
 0x153   :  { %v321_v47 = vpop.f32.mrb[31].mxu0  ;;  %v401_v48 = vpop.f32.mrb[31].mxu1  ;;  %450 = vst [vmem:[#allocation2 + $0x78] sm:$0xff] %v319_v45  ;;  %466 = vst [vmem:[#allocation2 + $0xf8] sm:$0xff] %v399_v46 }
 0x154   :  { %579 = shalt.err (!%p576_p4)
}
 0x155   :  { %s580_s4 = scalar_lea.hbm %s945_s2, 4096 }
 0x156   :  { %p581_p5 = scmp.ne.s32.totalorder %s945_s2, %s580_s4  ;;  %p584_p6 = scmp.lt.u32.totalorder %s580_s4, %s945_s2 }
 0x158   :  { %p586_p7 = pnand %p584_p6, %p581_p5 }
 0x15a   :  { %589 = shalt.err (!%p586_p7)
}
 0x15b   :  { %s594_s9 = smov 128   ;;  %s595_s10 = smov 8  }
 0x15c   :  { %478 = dma.vmem_to_hbm [thread:$0]  %s473_s28, 4096, %s945_s2, [#allocation3], %s594_s9, %s594_s9, %s595_s10  }
 0x15d   :  { %590 = dma.done.wait [#allocation3], 4096  }
 0x15e   :  { %591 = vsyncadd [#allocation3], 4294963200 }
 0x15f   :  { %482 = vsyncpa [#allocation3], 1 }

</bundles_post_ra>
